<compile_context>
chip_gen: v5e
topology: v5e:2x2
jax: 0.10.0
libtpu: 0.0.40
codegen_flags: <defaults>
</compile_context>

<pallas_src>
import functools

import jax
import jax.numpy as jnp
from jax.experimental import pallas as pl
from jax.experimental.pallas import tpu as pltpu

LANE = 128
SUBLANE = 8


def _round_up(n, m):
    return ((n + m - 1) // m) * m


def _make_mlp_kernel(n_hidden):
    """Kernel for n_hidden [Linear->Tanh] layers followed by a final Linear."""
    n_layers = n_hidden + 1

    def kernel(x_ref, *refs):
        o_ref = refs[-1]
        wb = refs[:-1]  # w0, b0, w1, b1, ..., w_{L-1}, b_{L-1}
        h = x_ref[...]
        for l in range(n_layers):
            w = wb[2 * l][...]
            b = wb[2 * l + 1][...]
            h = jnp.dot(h, w, preferred_element_type=jnp.float32) + b
            if l < n_hidden:
                h = jnp.tanh(h)
        o_ref[...] = h.astype(o_ref.dtype)

    return kernel


@functools.partial(jax.jit, static_argnames=("block_batch",))
def torch_mlp_forward(x, weights, biases, *, block_batch=512):
    """Fused MLP forward.

    Args:
      x: [batch, input_dim] activations.
      weights: list of [in_l, out_l] weight matrices (transposed vs PyTorch).
      biases: list of [out_l] bias vectors.
      block_batch: batch tile size (rows per grid step). Multiple of 8.
        Sized conservatively so double-buffered activation tiles + resident
        weights fit comfortably in v7x's 64 MiB VMEM as well as v5e/v6e's 128.
    """
    batch, d_in = x.shape
    n_layers = len(weights)
    n_hidden = n_layers - 1
    n_out = weights[-1].shape[1]
    dtype = x.dtype

    # ---- lane-dense padding of every layer's output width -------------------
    out_pads = [_round_up(w.shape[1], LANE) for w in weights]
    in_pads = [d_in] + out_pads[:-1]  # layer l consumes layer l-1's padded width

    padded_wb = []
    for l in range(n_layers):
        w, b = weights[l], biases[l]
        in_l, out_l = w.shape
        w_p = jnp.zeros((in_pads[l], out_pads[l]), dtype).at[:in_l, :out_l].set(w)
        b_p = jnp.zeros((1, out_pads[l]), dtype).at[0, :out_l].set(b)
        padded_wb += [w_p, b_p]

    # ---- batch tiling --------------------------------------------------------
    tb = min(block_batch, _round_up(batch, SUBLANE))
    tb = _round_up(tb, SUBLANE)
    batch_pad = _round_up(batch, tb)
    if batch_pad != batch:
        x = jnp.zeros((batch_pad, d_in), dtype).at[:batch].set(x)
    num_blocks = batch_pad // tb

    # ---- specs ---------------------------------------------------------------
    x_spec = pl.BlockSpec((tb, d_in), lambda i: (i, 0))
    resident = lambda a: pl.BlockSpec(a.shape, lambda i: (0, 0))  # noqa: E731
    wb_specs = [resident(a) for a in padded_wb]
    out_spec = pl.BlockSpec((tb, out_pads[-1]), lambda i: (i, 0))

    # ---- advisory cost estimate ---------------------------------------------
    flops = 2 * batch_pad * sum(in_pads[l] * out_pads[l] for l in range(n_layers))
    transcendentals = batch_pad * sum(out_pads[:-1])
    bytes_accessed = (
        x.size * x.dtype.itemsize
        + sum(a.size * a.dtype.itemsize for a in padded_wb)
        + batch_pad * out_pads[-1] * jnp.dtype(dtype).itemsize
    )

    out_padded = pl.pallas_call(
        _make_mlp_kernel(n_hidden),
        out_shape=jax.ShapeDtypeStruct((batch_pad, out_pads[-1]), dtype),
        grid=(num_blocks,),
        in_specs=[x_spec] + wb_specs,
        out_specs=out_spec,
        compiler_params=pltpu.CompilerParams(
            dimension_semantics=("parallel",),
        ),
        cost_estimate=pl.CostEstimate(
            flops=flops,
            transcendentals=transcendentals,
            bytes_accessed=bytes_accessed,
        ),
    )(x, *padded_wb)

    return out_padded[:batch, :n_out]


def _init_linear(key, fan_in, fan_out, dtype=jnp.float32):
    """Deterministic PyTorch-style init: U(-1/sqrt(fan_in), 1/sqrt(fan_in)).
    Weight returned as [fan_in, fan_out] (already transposed for x @ W)."""
    kw, kb = jax.random.split(key)
    bound = 1.0 / jnp.sqrt(jnp.asarray(fan_in, dtype))
    w = jax.random.uniform(kw, (fan_in, fan_out), dtype, -bound, bound)
    b = jax.random.uniform(kb, (fan_out,), dtype, -bound, bound)
    return w, b


def _reference_forward(x, weights, biases):
    h = x
    for l in range(len(weights) - 1):
        h = jnp.tanh(h @ weights[l] + biases[l])
    return h @ weights[-1] + biases[-1]


if __name__ == "__main__":
    # Synthetic configuration mirroring an sklearn MLP with
    # hidden_layer_sizes=(32, 32) and n_outputs_=4, input_dim=16.
    batch = 8
    input_dim = 16
    hidden_layer_sizes = (32, 32)
    n_outputs = 4

    key = jax.random.PRNGKey(0)
    keys = jax.random.split(key, 1 + len(hidden_layer_sizes) + 1)
    kx, layer_keys = keys[0], keys[1:]

    x = jax.random.normal(kx, (batch, input_dim), jnp.float32)

    layer_dims = [input_dim, *hidden_layer_sizes, n_outputs]
    weights, biases = [], []
    for l, kl in enumerate(layer_keys):
        w, b = _init_linear(kl, layer_dims[l], layer_dims[l + 1])
        weights.append(w)
        biases.append(b)

    out = torch_mlp_forward(x, weights, biases)
    out = jax.block_until_ready(out)

    ref = _reference_forward(x, weights, biases)
    assert out.shape == (batch, n_outputs)
    assert jnp.allclose(out, ref, atol=1e-5, rtol=1e-5), "mismatch vs reference"

    print("KERNEL_OK")
</pallas_src>

<mosaic_0001>
module attributes {stable_mosaic.version = 11 : i64} {
  func.func @kernel(%arg0: i32, %arg1: memref<8x16xf32, #tpu.memory_space<vmem>>, %arg2: memref<16x128xf32, #tpu.memory_space<vmem>>, %arg3: memref<1x128xf32, #tpu.memory_space<vmem>>, %arg4: memref<128x128xf32, #tpu.memory_space<vmem>>, %arg5: memref<1x128xf32, #tpu.memory_space<vmem>>, %arg6: memref<128x128xf32, #tpu.memory_space<vmem>>, %arg7: memref<1x128xf32, #tpu.memory_space<vmem>>, %arg8: memref<8x128xf32, #tpu.memory_space<vmem>>) attributes {dimension_semantics = [#tpu.dimension_semantics<parallel>], iteration_bounds = array<i64: 1>, scalar_prefetch = 0 : i64, scratch_operands = 0 : i64, tpu.core_type = #tpu.core_type<tc>, window_params = [{transform_indices = @transform_0, window_bounds = array<i64: 8, 16>}, {pipeline_mode = #tpu.pipeline_mode<synchronous>, transform_indices = @transform_1, window_bounds = array<i64: 16, 128>}, {pipeline_mode = #tpu.pipeline_mode<synchronous>, transform_indices = @transform_2, window_bounds = array<i64: 1, 128>}, {pipeline_mode = #tpu.pipeline_mode<synchronous>, transform_indices = @transform_3, window_bounds = array<i64: 128, 128>}, {pipeline_mode = #tpu.pipeline_mode<synchronous>, transform_indices = @transform_4, window_bounds = array<i64: 1, 128>}, {pipeline_mode = #tpu.pipeline_mode<synchronous>, transform_indices = @transform_5, window_bounds = array<i64: 128, 128>}, {pipeline_mode = #tpu.pipeline_mode<synchronous>, transform_indices = @transform_6, window_bounds = array<i64: 1, 128>}, {transform_indices = @transform_7, window_bounds = array<i64: 8, 128>}]} {
    %c0 = arith.constant 0 : index
    %c0_0 = arith.constant 0 : index
    %0 = vector.load %arg1[%c0, %c0_0] : memref<8x16xf32, #tpu.memory_space<vmem>>, vector<8x16xf32>
    %c0_1 = arith.constant 0 : index
    %c0_2 = arith.constant 0 : index
    %1 = vector.load %arg2[%c0_1, %c0_2] : memref<16x128xf32, #tpu.memory_space<vmem>>, vector<16x128xf32>
    %c0_3 = arith.constant 0 : index
    %c0_4 = arith.constant 0 : index
    %2 = vector.load %arg3[%c0_3, %c0_4] : memref<1x128xf32, #tpu.memory_space<vmem>>, vector<1x128xf32>
    %cst = arith.constant dense<0.000000e+00> : vector<8x128xf32>
    %3 = tpu.matmul %0, %1, %cst {dimension_numbers = #tpu.dot_dimension_numbers<[1], [0], [0], [1], [0, 0, 1, 1], [], []>} : vector<8x16xf32>, vector<16x128xf32>, vector<8x128xf32> -> vector<8x128xf32>
    %4 = vector.broadcast %2 : vector<1x128xf32> to vector<8x128xf32>
    %5 = arith.addf %3, %4 : vector<8x128xf32>
    %6 = math.tanh %5 : vector<8x128xf32>
    %c0_5 = arith.constant 0 : index
    %c0_6 = arith.constant 0 : index
    %7 = vector.load %arg4[%c0_5, %c0_6] : memref<128x128xf32, #tpu.memory_space<vmem>>, vector<128x128xf32>
    %c0_7 = arith.constant 0 : index
    %c0_8 = arith.constant 0 : index
    %8 = vector.load %arg5[%c0_7, %c0_8] : memref<1x128xf32, #tpu.memory_space<vmem>>, vector<1x128xf32>
    %cst_9 = arith.constant dense<0.000000e+00> : vector<8x128xf32>
    %9 = tpu.matmul %6, %7, %cst_9 {dimension_numbers = #tpu.dot_dimension_numbers<[1], [0], [0], [1], [0, 0, 1, 1], [], []>} : vector<8x128xf32>, vector<128x128xf32>, vector<8x128xf32> -> vector<8x128xf32>
    %10 = vector.broadcast %8 : vector<1x128xf32> to vector<8x128xf32>
    %11 = arith.addf %9, %10 : vector<8x128xf32>
    %12 = math.tanh %11 : vector<8x128xf32>
    %c0_10 = arith.constant 0 : index
    %c0_11 = arith.constant 0 : index
    %13 = vector.load %arg6[%c0_10, %c0_11] : memref<128x128xf32, #tpu.memory_space<vmem>>, vector<128x128xf32>
    %c0_12 = arith.constant 0 : index
    %c0_13 = arith.constant 0 : index
    %14 = vector.load %arg7[%c0_12, %c0_13] : memref<1x128xf32, #tpu.memory_space<vmem>>, vector<1x128xf32>
    %cst_14 = arith.constant dense<0.000000e+00> : vector<8x128xf32>
    %15 = tpu.matmul %12, %13, %cst_14 {dimension_numbers = #tpu.dot_dimension_numbers<[1], [0], [0], [1], [0, 0, 1, 1], [], []>} : vector<8x128xf32>, vector<128x128xf32>, vector<8x128xf32> -> vector<8x128xf32>
    %16 = vector.broadcast %14 : vector<1x128xf32> to vector<8x128xf32>
    %17 = arith.addf %15, %16 : vector<8x128xf32>
    %c0_15 = arith.constant 0 : index
    %c0_16 = arith.constant 0 : index
    %18 = vector.load %arg8[%c0_15, %c0_16] : memref<8x128xf32, #tpu.memory_space<vmem>>, vector<8x128xf32>
    tpu.vector_store %arg8[%c0_15, %c0_16], %17 {strides = array<i32>} : memref<8x128xf32, #tpu.memory_space<vmem>>, vector<8x128xf32>,
    return
  }
  func.func @transform_0(%arg0: i32) -> (i32, i32) {
    %c0_i32 = arith.constant 0 : i32
    %c0_i32_0 = arith.constant 0 : i32
    return %arg0, %c0_i32 : i32, i32
  }
  func.func @transform_1(%arg0: i32) -> (i32, i32) {
    %c0_i32 = arith.constant 0 : i32
    %c0_i32_0 = arith.constant 0 : i32
    %c0_i32_1 = arith.constant 0 : i32
    return %c0_i32, %c0_i32_0 : i32, i32
  }
  func.func @transform_2(%arg0: i32) -> (i32, i32) {
    %c0_i32 = arith.constant 0 : i32
    %c0_i32_0 = arith.constant 0 : i32
    %c0_i32_1 = arith.constant 0 : i32
    return %c0_i32, %c0_i32_0 : i32, i32
  }
  func.func @transform_3(%arg0: i32) -> (i32, i32) {
    %c0_i32 = arith.constant 0 : i32
    %c0_i32_0 = arith.constant 0 : i32
    %c0_i32_1 = arith.constant 0 : i32
    return %c0_i32, %c0_i32_0 : i32, i32
  }
  func.func @transform_4(%arg0: i32) -> (i32, i32) {
    %c0_i32 = arith.constant 0 : i32
    %c0_i32_0 = arith.constant 0 : i32
    %c0_i32_1 = arith.constant 0 : i32
    return %c0_i32, %c0_i32_0 : i32, i32
  }
  func.func @transform_5(%arg0: i32) -> (i32, i32) {
    %c0_i32 = arith.constant 0 : i32
    %c0_i32_0 = arith.constant 0 : i32
    %c0_i32_1 = arith.constant 0 : i32
    return %c0_i32, %c0_i32_0 : i32, i32
  }
  func.func @transform_6(%arg0: i32) -> (i32, i32) {
    %c0_i32 = arith.constant 0 : i32
    %c0_i32_0 = arith.constant 0 : i32
    %c0_i32_1 = arith.constant 0 : i32
    return %c0_i32, %c0_i32_0 : i32, i32
  }
  func.func @transform_7(%arg0: i32) -> (i32, i32) {
    %c0_i32 = arith.constant 0 : i32
    %c0_i32_0 = arith.constant 0 : i32
    return %arg0, %c0_i32 : i32, i32
  }
}

</mosaic_0001>

<bundles_post_ra>
// kernel: torch_mlp_forward.1
= control target key start
LH: loop header
LB: loop body
LE: loop exit
PB: predicated region body
PF: predicated region fallthrough
CT: control target
= control target key end

     0   :  { %vm33_vm0 = vcmask 130048   ;;  %s309_s1 = inlined_call_operand.vmem [shape: f32[16,128], index: 1, kind: input, shape index: {}]   ;;  %s310_s0 = inlined_call_operand.vmem [shape: f32[8,16], index: 0, kind: input, shape index: {}]   ;;  %s311_s3 = inlined_call_operand.vmem [shape: f32[128,128], index: 3, kind: input, shape index: {}]   ;;  %s312_s2 = inlined_call_operand.vmem [shape: f32[1,128], index: 2, kind: input, shape index: {}]   ;;  %s313_s4 = inlined_call_operand.vmem [shape: f32[1,128], index: 4, kind: input, shape index: {}]   ;;  %s314_s5 = inlined_call_operand.vmem [shape: f32[128,128], index: 5, kind: input, shape index: {}]   ;;  %s315_s6 = inlined_call_operand.vmem [shape: f32[1,128], index: 6, kind: input, shape index: {}]   ;;  %s316_s7 = inlined_call_operand.vmem [shape: f32[8,128], index: 7, kind: output, shape index: {}]  }
   0x1   :  { %v28_v0 = vld [vmem:[%s309_s1 + $0x8] sm:$0xff]  ;;  %v27_v1 = vld [vmem:[%s309_s1] sm:$0xff]  ;;  %v73_v3 = vld [vmem:[%s311_s3 + $0x78] sm:$0xff] }
   0x2   :  { %51 = vmatpush.msra.mxu0 %v28_v0  ;;  %v26_v2 = vld [vmem:[%s310_s0] sm:$0xff]  ;;  %v72_v4 = vld [vmem:[%s311_s3 + $0x70] sm:$0xff]  ;;  %78 = vmatpush.msra.mxu1 %v73_v3  ;;  %v71_v5 = vld [vmem:[%s311_s3 + $0x68] sm:$0xff] }
   0x3   :  { %v70_v6 = vld [vmem:[%s311_s3 + $0x60] sm:$0xff]  ;;  %v69_v7 = vld [vmem:[%s311_s3 + $0x58] sm:$0xff]  ;;  %v68_v8 = vld [vmem:[%s311_s3 + $0x50] sm:$0xff] }
   0x4   :  { %52 = vmatpush.msra.mxu0 %v27_v1  ;;  %79 = vmatpush.msra.mxu1 %v72_v4  ;;  %v67_v9 = vld [vmem:[%s311_s3 + $0x48] sm:$0xff]  ;;  %v66_v10 = vld [vmem:[%s311_s3 + $0x40] sm:$0xff]  ;;  %v65_v11 = vld [vmem:[%s311_s3 + $0x38] sm:$0xff] }
   0x5   :  { %144 = vmatmul.msk.f32.vlgmr.msra.gmra.mxu0 %vm33_vm0, %v26_v2  ;;  %v64_v12 = vld [vmem:[%s311_s3 + $0x30] sm:$0xff]  ;;  %v63_v13 = vld [vmem:[%s311_s3 + $0x28] sm:$0xff]  ;;  %v62_v14 = vld [vmem:[%s311_s3 + $0x20] sm:$0xff] }
   0x6   :  { %80 = vmatpush.msra.mxu1 %v71_v5  ;;  %v61_v15 = vld [vmem:[%s311_s3 + $0x18] sm:$0xff]  ;;  %v60_v16 = vld [vmem:[%s311_s3 + $0x10] sm:$0xff]  ;;  %v59_v17 = vld [vmem:[%s311_s3 + $0x8] sm:$0xff] }
   0x7   :  { %v58_v18 = vld [vmem:[%s311_s3] sm:$0xff]  ;;  %v114_v19 = vld [vmem:[%s314_s5 + $0x78] sm:$0xff]  ;;  %v113_v20 = vld [vmem:[%s314_s5 + $0x70] sm:$0xff] }
   0x8   :  { %81 = vmatpush.msra.mxu1 %v70_v6  ;;  %119 = vmatpush.msra.mxu2 %v114_v19  ;;  %v112_v21 = vld [vmem:[%s314_s5 + $0x68] sm:$0xff]  ;;  %v111_v22 = vld [vmem:[%s314_s5 + $0x60] sm:$0xff]  ;;  %v110_v23 = vld [vmem:[%s314_s5 + $0x58] sm:$0xff] }
   0x9   :  { %v109_v24 = vld [vmem:[%s314_s5 + $0x50] sm:$0xff]  ;;  %v108_v25 = vld [vmem:[%s314_s5 + $0x48] sm:$0xff]  ;;  %v107_v26 = vld [vmem:[%s314_s5 + $0x40] sm:$0xff] }
   0xa   :  { %82 = vmatpush.msra.mxu1 %v69_v7  ;;  %120 = vmatpush.msra.mxu2 %v113_v20  ;;  %v106_v27 = vld [vmem:[%s314_s5 + $0x38] sm:$0xff]  ;;  %v105_v28 = vld [vmem:[%s314_s5 + $0x30] sm:$0xff]  ;;  %v104_v29 = vld [vmem:[%s314_s5 + $0x28] sm:$0xff] }
   0xb   :  { %v145_v30 = vld [vmem:[%s312_s2] ss:$0 sm:$0xff]  ;;  %v102_v35 = vld [vmem:[%s314_s5 + $0x18] sm:$0xff]  ;;  %v101_v36 = vld [vmem:[%s314_s5 + $0x10] sm:$0xff] }
   0xc   :  { %83 = vmatpush.msra.mxu1 %v68_v8  ;;  %121 = vmatpush.msra.mxu2 %v112_v21  ;;  %v103_v34 = vld [vmem:[%s314_s5 + $0x20] sm:$0xff]  ;;  %v100_v37 = vld [vmem:[%s314_s5 + $0x8] sm:$0xff] }
   0xd   :  { %v99_v38 = vld [vmem:[%s314_s5] sm:$0xff] }
   0xe   :  { %84 = vmatpush.msra.mxu1 %v67_v9  ;;  %122 = vmatpush.msra.mxu2 %v111_v22  ;;  %v146_v39 = vld [vmem:[%s313_s4] ss:$0 sm:$0xff] }
   0xf   :  { %v147_v43 = vld [vmem:[%s315_s6] ss:$0 sm:$0xff] }
  0x10   :  { %85 = vmatpush.msra.mxu1 %v66_v10  ;;  %123 = vmatpush.msra.mxu2 %v110_v23 }
  0x12   :  { %86 = vmatpush.msra.mxu1 %v65_v11  ;;  %124 = vmatpush.msra.mxu2 %v109_v24 }
  0x14   :  { %87 = vmatpush.msra.mxu1 %v64_v12  ;;  %125 = vmatpush.msra.mxu2 %v108_v25 }
  0x16   :  { %88 = vmatpush.msra.mxu1 %v63_v13  ;;  %126 = vmatpush.msra.mxu2 %v107_v26 }
  0x18   :  { %89 = vmatpush.msra.mxu1 %v62_v14  ;;  %127 = vmatpush.msra.mxu2 %v106_v27 }
  0x1a   :  { %90 = vmatpush.msra.mxu1 %v61_v15  ;;  %128 = vmatpush.msra.mxu2 %v105_v28 }
  0x1c   :  { %91 = vmatpush.msra.mxu1 %v60_v16  ;;  %129 = vmatpush.msra.mxu2 %v104_v29 }
  0x1e   :  { %92 = vmatpush.msra.mxu1 %v59_v17  ;;  %130 = vmatpush.msra.mxu2 %v103_v34 }
  0x20   :  { %93 = vmatpush.msra.mxu1 %v58_v18  ;;  %131 = vmatpush.msra.mxu2 %v102_v35 }
  0x22   :  { %132 = vmatpush.msra.mxu2 %v101_v36 }
  0x24   :  { %133 = vmatpush.msra.mxu2 %v100_v37 }
  0x26   :  { %134 = vmatpush.msra.mxu2 %v99_v38 }
  0x82   :  { %v54_v31 = vpop.f32.mrf.mxu0 }
  0x83   :  { %v55_v32 = vadd.f32 %v145_v30, %v54_v31 }
  0x85   :  { %148 = vtanh.f32 %v55_v32 }
  0x8b   :  { %v149_v33 = vpop.eup %148 }
  0x8c   :  { %94 = vmatmul.f32.vlgmr.msra.gmra.mxu1 %v149_v33 }
 0x109   :  { %v95_v40 = vpop.f32.mrf.mxu1 }
 0x10a   :  { %v96_v41 = vadd.f32 %v146_v39, %v95_v40 }
 0x10c   :  { %150 = vtanh.f32 %v96_v41 }
 0x112   :  { %v151_v42 = vpop.eup %150 }
 0x113   :  { %135 = vmatmul.f32.vlgmr.msra.gmra.mxu2 %v151_v42 }
 0x196   :  { %v136_v44 = vpop.f32.mrf.mxu2 }
 0x197   :  { %v137_v45 = vadd.f32 %v147_v43, %v136_v44 }
 0x199   :  { %139 = vst [vmem:[%s316_s7] sm:$0xff] %v137_v45 }

</bundles_post_ra>
